<compile_context>
chip_gen: v5e
topology: v5e:2x2
jax: 0.10.0
libtpu: 0.0.40
codegen_flags: <defaults>
</compile_context>

<pallas_src>
import jax
import jax.numpy as jnp
from jax.experimental import pallas as pl
from jax.experimental.pallas import tpu as pltpu

KSIZE = 7
PAD = 3
# Row offset of the tile body inside the window scratch.  16 is sublane-aligned
# for both f32 (8-row vregs) and bf16 (16-row packed vregs), so the big
# tile -> scratch copy is a plain aligned copy; only the 3-row halo writes and
# the shifted tap reads are misaligned.
XOFF = 16


def peg_kernel(x_ref, halo_ref, w_ref, b_ref, o_ref, xp_ref):
    """One (batch-tile, L-tile) block per grid step.

    x_ref:    (TB, tL, W)             un-padded input tile (input dtype)
    halo_ref: (TB, 1, 2*PAD, W)       rows [0:PAD)  = 3 rows preceding the tile
                                      rows [PAD:)   = 3 rows following the tile
                                      (zeros at the sequence ends)
    w_ref:    (KSIZE, W) float32      depthwise taps; center tap already has +1.0
                                      folded in (the residual x + conv(x))
    b_ref:    (1, W) float32          bias
    o_ref:    (TB, tL, W)             output (input dtype)
    xp_ref:   (TB, XOFF+tL+PAD, W)    VMEM scratch: halo-padded window
    """
    TB, tL, W = o_ref.shape

    # Stitch the halo-padded window in VMEM.
    #   rows [XOFF-PAD, XOFF)        <- preceding halo (tiny, misaligned)
    #   rows [XOFF, XOFF+tL)         <- the tile (aligned vreg copy)
    #   rows [XOFF+tL, XOFF+tL+PAD)  <- following halo (tiny)
    xp_ref[:, XOFF - PAD:XOFF, :] = halo_ref[:, 0, 0:PAD, :]
    xp_ref[:, XOFF:XOFF + tL, :] = x_ref[...]
    xp_ref[:, XOFF + tL:XOFF + tL + PAD, :] = halo_ref[:, 0, PAD:2 * PAD, :]

    # Hoist the (tiny, f32) parameter rows out of the tap loop.
    w_rows = w_ref[...]           # (KSIZE, W) float32
    b_row = b_ref[...]            # (1, W)     float32

    # Depthwise conv = sum of 7 shifted copies scaled per channel (static unroll).
    # Accumulate in f32; residual is folded into the center tap.
    acc = None
    for k in range(KSIZE):
        lo = XOFF - PAD + k
        xs = xp_ref[:, lo:lo + tL, :].astype(jnp.float32)   # (TB, tL, W)
        term = xs * w_rows[k]                               # (W,) broadcast
        acc = term if acc is None else acc + term
    acc = acc + b_row                                       # (1, W) broadcast

    o_ref[...] = acc.astype(o_ref.dtype)


def _hw_config():
    """Per-generation tuning: (vmem_cap, block_budget, base_vmem_limit, multi_tc)."""
    cap = None
    try:
        cap = int(pltpu.get_tpu_info().vmem_capacity_bytes)
    except Exception:
        cap = None
    kind = ""
    try:
        kind = jax.devices()[0].device_kind.lower()
    except Exception:
        pass
    # v5e / v6e ("lite") parts have a single TensorCore per chip.
    single_tc = any(t in kind for t in ("lite", "v5e", "v6e"))
    if cap is None:
        cap = 64 * 1024 * 1024                    # conservative (v7x-class) default
    if cap <= 64 * 1024 * 1024:                   # v7x-class: 64 MiB VMEM per core
        block_budget = 4 * 1024 * 1024
        base_limit = 40 * 1024 * 1024
    else:                                         # 128 MiB VMEM parts (v5e/v6e/...)
        block_budget = 12 * 1024 * 1024
        base_limit = 96 * 1024 * 1024
    return cap, block_budget, base_limit, (not single_tc)


def _choose_tiles(B, L, W, itemsize, block_budget_bytes, prefer_multi_step):
    """Pick (TB, tL) with TB | B and tL | L (tL a multiple of 8 whenever L is tiled)."""
    row_bytes = W * itemsize

    if L * row_bytes <= block_budget_bytes:
        tL = L
    else:
        best = None
        for d in range(8, L + 1, 8):
            if L % d == 0 and d * row_bytes <= block_budget_bytes:
                best = d
        if best is None:
            # Nothing fits the budget: take the smallest multiple-of-8 divisor
            # (minimises the overshoot) instead of falling back to the whole L.
            # TODO(synk): masked remainder tile for L with no multiple-of-8 divisor.
            for d in range(8, L + 1, 8):
                if L % d == 0:
                    best = d
                    break
        tL = best if best is not None else L
    Lt = L // tL

    # Batch tile: largest divisor of B whose block still fits the budget.
    TB = 1
    for d in range(1, B + 1):
        if B % d == 0 and d * tL * row_bytes <= block_budget_bytes:
            TB = d

    # Keep >= 2 grid steps only on multi-TensorCore chips (v7x class) so both
    # cores get work; on single-TC parts extra steps are pure per-step overhead.
    if prefer_multi_step and Lt * (B // TB) < 2 and B >= 2:
        for d in range(B // 2, 0, -1):
            if B % d == 0:
                TB = d
                break
    return TB, tL


def peg_layer(x, weight, bias, *, p_drop=0.0, block_budget_bytes=None):
    """x: (B, L, W). weight: (W, 1, KSIZE) (PyTorch depthwise layout). bias: (W,)."""
    # TODO(synk): dropout with p > 0 (train-mode RNG masking) is not implemented;
    # the module default p_drop=0.0 is an identity, which is what the kernel does.
    assert p_drop == 0.0, "PEG Pallas kernel only implements p_drop == 0.0"

    B, L, W = x.shape
    itemsize = jnp.dtype(x.dtype).itemsize

    cap, auto_budget, base_limit, prefer_multi_step = _hw_config()
    budget = auto_budget if block_budget_bytes is None else block_budget_bytes
    TB, tL = _choose_tiles(B, L, W, itemsize, budget, prefer_multi_step)
    Lt = L // tL

    # Parameters in float32: taps as (KSIZE, W) with the residual folded into the
    # center tap, bias as a (1, W) row.  (bf16 weights stay exact this way.)
    w_taps = jnp.transpose(weight[:, 0, :], (1, 0)).astype(jnp.float32)
    w_taps = w_taps.at[PAD].add(1.0)
    b2 = bias.astype(jnp.float32).reshape(1, W)

    # Halo rows: for every L tile, the PAD rows preceding and the PAD rows
    # following it (zeros at the sequence ends), merged into ONE small array so
    # each grid step issues a single extra (tiny) DMA.
    if Lt == 1:
        halo = jnp.zeros((B, 1, 2 * PAD, W), dtype=x.dtype)
    else:
        xt = x.reshape(B, Lt, tL, W)
        zero = jnp.zeros((B, 1, PAD, W), dtype=x.dtype)
        lo = jnp.concatenate([zero, xt[:, :-1, tL - PAD:, :]], axis=1)
        hi = jnp.concatenate([xt[:, 1:, :PAD, :], zero], axis=1)
        halo = jnp.concatenate([lo, hi], axis=2)               # (B, Lt, 2*PAD, W)

    # VMEM budget: ~5 resident blocks (2x double-buffered in, 2x out, window
    # scratch) + the f32 accumulator + slack.
    block_bytes = TB * tL * W * itemsize
    needed = 5 * block_bytes + 2 * (TB * tL * W * 4) + (2 << 20)
    vmem_limit = int(min(max(base_limit, needed), cap))

    out = pl.pallas_call(
        peg_kernel,
        out_shape=jax.ShapeDtypeStruct((B, L, W), x.dtype),
        grid_spec=pltpu.PrefetchScalarGridSpec(
            num_scalar_prefetch=0,
            grid=(B // TB, Lt),
            in_specs=[
                pl.BlockSpec((TB, tL, W), lambda bi, li: (bi, li, 0)),
                pl.BlockSpec((TB, 1, 2 * PAD, W), lambda bi, li: (bi, li, 0, 0)),
                pl.BlockSpec((KSIZE, W), lambda bi, li: (0, 0)),
                pl.BlockSpec((1, W), lambda bi, li: (0, 0)),
            ],
            out_specs=pl.BlockSpec((TB, tL, W), lambda bi, li: (bi, li, 0)),
            scratch_shapes=[pltpu.VMEM((TB, XOFF + tL + PAD, W), x.dtype)],
        ),
        compiler_params=pltpu.CompilerParams(
            dimension_semantics=("parallel", "parallel"),
            vmem_limit_bytes=vmem_limit,
        ),
    )(x, halo, w_taps, b2)
    return out


def peg_layer_ref(x, weight, bias):
    """Pure-JAX reference (depthwise conv1d, padding=3) in float32."""
    B, L, W = x.shape
    x_ncw = jnp.transpose(x, (0, 2, 1)).astype(jnp.float32)     # (B, W, L)
    y = jax.lax.conv_general_dilated(
        x_ncw, weight.astype(jnp.float32),
        window_strides=(1,), padding=[(PAD, PAD)],
        dimension_numbers=("NCH", "OIH", "NCH"),
        feature_group_count=W)
    y = y + bias.astype(jnp.float32)[None, :, None]
    return x.astype(jnp.float32) + jnp.transpose(y, (0, 2, 1))


if __name__ == "__main__":
    root = jax.random.PRNGKey(0)
    k1, k2, k3 = jax.random.split(root, 3)

    # Test 1: module-consistent small shape (batch=2, seq=16, width=32), f32.
    B, L, W = 2, 16, 32
    kx, kw, kb = jax.random.split(k1, 3)
    x = jax.random.normal(kx, (B, L, W), dtype=jnp.float32)
    weight = jax.random.normal(kw, (W, 1, KSIZE), dtype=jnp.float32) * 0.1
    bias = jax.random.normal(kb, (W,), dtype=jnp.float32) * 0.1
    out = jax.block_until_ready(peg_layer(x, weight, bias))
    ref = peg_layer_ref(x, weight, bias)
    assert jnp.allclose(out, ref, atol=1e-5, rtol=1e-5), "mismatch vs reference (test 1)"

    # Test 2: force L tiling (tL=8, Lt=8) to exercise the tile-boundary halo path.
    B2, L2, W2 = 2, 64, 32
    kx, kw, kb = jax.random.split(k2, 3)
    x2 = jax.random.normal(kx, (B2, L2, W2), dtype=jnp.float32)
    weight2 = jax.random.normal(kw, (W2, 1, KSIZE), dtype=jnp.float32) * 0.1
    bias2 = jax.random.normal(kb, (W2,), dtype=jnp.float32) * 0.1
    out2 = jax.block_until_ready(
        peg_layer(x2, weight2, bias2, block_budget_bytes=8 * W2 * 4))
    ref2 = peg_layer_ref(x2, weight2, bias2)
    assert jnp.allclose(out2, ref2, atol=1e-5, rtol=1e-5), "mismatch vs reference (test 2)"

    # Test 3: bf16 I/O (f32 accumulation inside the kernel), lane-dense W=128.
    B3, L3, W3 = 2, 32, 128
    kx, kw, kb = jax.random.split(k3, 3)
    x3 = jax.random.normal(kx, (B3, L3, W3), dtype=jnp.float32).astype(jnp.bfloat16)
    weight3 = jax.random.normal(kw, (W3, 1, KSIZE), dtype=jnp.float32) * 0.1
    bias3 = jax.random.normal(kb, (W3,), dtype=jnp.float32) * 0.1
    out3 = jax.block_until_ready(peg_layer(x3, weight3, bias3))
    ref3 = peg_layer_ref(x3.astype(jnp.float32), weight3, bias3)
    assert jnp.allclose(out3.astype(jnp.float32), ref3, atol=5e-2, rtol=5e-2), \
        "mismatch vs reference (test 3, bf16)"

    print("KERNEL_OK")
</pallas_src>

<mosaic_0001>
module attributes {stable_mosaic.version = 11 : i64} {
  func.func @peg_kernel(%arg0: i32, %arg1: i32, %arg2: memref<1x16x32xf32, #tpu.memory_space<vmem>>, %arg3: memref<1x1x6x32xf32, #tpu.memory_space<vmem>>, %arg4: memref<7x32xf32, #tpu.memory_space<vmem>>, %arg5: memref<1x32xf32, #tpu.memory_space<vmem>>, %arg6: memref<1x16x32xf32, #tpu.memory_space<vmem>>, %arg7: memref<1x35x32xf32, #tpu.memory_space<vmem>>) attributes {dimension_semantics = [#tpu.dimension_semantics<parallel>, #tpu.dimension_semantics<parallel>], iteration_bounds = array<i64: 2, 1>, scalar_prefetch = 0 : i64, scratch_operands = 1 : i64, tpu.core_type = #tpu.core_type<tc>, window_params = [{transform_indices = @transform_0, window_bounds = array<i64: 1, 16, 32>}, {transform_indices = @transform_1, window_bounds = array<i64: 1, 1, 6, 32>}, {pipeline_mode = #tpu.pipeline_mode<synchronous>, transform_indices = @transform_2, window_bounds = array<i64: 7, 32>}, {pipeline_mode = #tpu.pipeline_mode<synchronous>, transform_indices = @transform_3, window_bounds = array<i64: 1, 32>}, {transform_indices = @transform_4, window_bounds = array<i64: 1, 16, 32>}]} {
    %c0 = arith.constant 0 : index
    %c0_0 = arith.constant 0 : index
    %c0_1 = arith.constant 0 : index
    %c0_2 = arith.constant 0 : index
    %0 = vector.load %arg3[%c0, %c0_0, %c0_1, %c0_2] : memref<1x1x6x32xf32, #tpu.memory_space<vmem>>, vector<1x1x3x32xf32>
    %1 = vector.shape_cast %0 : vector<1x1x3x32xf32> to vector<1x3x32xf32>
    %c0_3 = arith.constant 0 : index
    %c13 = arith.constant 13 : index
    %c0_4 = arith.constant 0 : index
    %2 = vector.load %arg7[%c0_3, %c13, %c0_4] : memref<1x35x32xf32, #tpu.memory_space<vmem>>, vector<1x3x32xf32>
    tpu.vector_store %arg7[%c0_3, %c13, %c0_4], %1 {strides = array<i32>} : memref<1x35x32xf32, #tpu.memory_space<vmem>>, vector<1x3x32xf32>,
    %c0_5 = arith.constant 0 : index
    %c0_6 = arith.constant 0 : index
    %c0_7 = arith.constant 0 : index
    %3 = vector.load %arg2[%c0_5, %c0_6, %c0_7] : memref<1x16x32xf32, #tpu.memory_space<vmem>>, vector<1x16x32xf32>
    %c0_8 = arith.constant 0 : index
    %c16 = arith.constant 16 : index
    %c0_9 = arith.constant 0 : index
    %4 = vector.load %arg7[%c0_8, %c16, %c0_9] : memref<1x35x32xf32, #tpu.memory_space<vmem>>, vector<1x16x32xf32>
    tpu.vector_store %arg7[%c0_8, %c16, %c0_9], %3 {strides = array<i32>} : memref<1x35x32xf32, #tpu.memory_space<vmem>>, vector<1x16x32xf32>,
    %c0_10 = arith.constant 0 : index
    %c0_11 = arith.constant 0 : index
    %c3 = arith.constant 3 : index
    %c0_12 = arith.constant 0 : index
    %5 = vector.load %arg3[%c0_10, %c0_11, %c3, %c0_12] : memref<1x1x6x32xf32, #tpu.memory_space<vmem>>, vector<1x1x3x32xf32>
    %6 = vector.shape_cast %5 : vector<1x1x3x32xf32> to vector<1x3x32xf32>
    %c0_13 = arith.constant 0 : index
    %c32 = arith.constant 32 : index
    %c0_14 = arith.constant 0 : index
    %7 = vector.load %arg7[%c0_13, %c32, %c0_14] : memref<1x35x32xf32, #tpu.memory_space<vmem>>, vector<1x3x32xf32>
    tpu.vector_store %arg7[%c0_13, %c32, %c0_14], %6 {strides = array<i32>} : memref<1x35x32xf32, #tpu.memory_space<vmem>>, vector<1x3x32xf32>,
    %c0_15 = arith.constant 0 : index
    %c0_16 = arith.constant 0 : index
    %8 = vector.load %arg4[%c0_15, %c0_16] : memref<7x32xf32, #tpu.memory_space<vmem>>, vector<7x32xf32>
    %c0_17 = arith.constant 0 : index
    %c0_18 = arith.constant 0 : index
    %9 = vector.load %arg5[%c0_17, %c0_18] : memref<1x32xf32, #tpu.memory_space<vmem>>, vector<1x32xf32>
    %c0_19 = arith.constant 0 : index
    %c13_20 = arith.constant 13 : index
    %c0_21 = arith.constant 0 : index
    %10 = vector.load %arg7[%c0_19, %c13_20, %c0_21] : memref<1x35x32xf32, #tpu.memory_space<vmem>>, vector<1x16x32xf32>
    %11 = vector.extract_strided_slice %8 {offsets = [0, 0], sizes = [1, 32], strides = [1, 1]} : vector<7x32xf32> to vector<1x32xf32>
    %12 = vector.shape_cast %11 : vector<1x32xf32> to vector<32xf32>
    %13 = vector.shape_cast %12 : vector<32xf32> to vector<1x1x32xf32>
    %14 = vector.broadcast %13 : vector<1x1x32xf32> to vector<1x16x32xf32>
    %15 = arith.mulf %10, %14 : vector<1x16x32xf32>
    %c0_22 = arith.constant 0 : index
    %c14 = arith.constant 14 : index
    %c0_23 = arith.constant 0 : index
    %16 = vector.load %arg7[%c0_22, %c14, %c0_23] : memref<1x35x32xf32, #tpu.memory_space<vmem>>, vector<1x16x32xf32>
    %17 = vector.extract_strided_slice %8 {offsets = [1, 0], sizes = [1, 32], strides = [1, 1]} : vector<7x32xf32> to vector<1x32xf32>
    %18 = vector.shape_cast %17 : vector<1x32xf32> to vector<32xf32>
    %19 = vector.shape_cast %18 : vector<32xf32> to vector<1x1x32xf32>
    %20 = vector.broadcast %19 : vector<1x1x32xf32> to vector<1x16x32xf32>
    %21 = arith.mulf %16, %20 : vector<1x16x32xf32>
    %22 = arith.addf %15, %21 : vector<1x16x32xf32>
    %c0_24 = arith.constant 0 : index
    %c15 = arith.constant 15 : index
    %c0_25 = arith.constant 0 : index
    %23 = vector.load %arg7[%c0_24, %c15, %c0_25] : memref<1x35x32xf32, #tpu.memory_space<vmem>>, vector<1x16x32xf32>
    %24 = vector.extract_strided_slice %8 {offsets = [2, 0], sizes = [1, 32], strides = [1, 1]} : vector<7x32xf32> to vector<1x32xf32>
    %25 = vector.shape_cast %24 : vector<1x32xf32> to vector<32xf32>
    %26 = vector.shape_cast %25 : vector<32xf32> to vector<1x1x32xf32>
    %27 = vector.broadcast %26 : vector<1x1x32xf32> to vector<1x16x32xf32>
    %28 = arith.mulf %23, %27 : vector<1x16x32xf32>
    %29 = arith.addf %22, %28 : vector<1x16x32xf32>
    %c0_26 = arith.constant 0 : index
    %c16_27 = arith.constant 16 : index
    %c0_28 = arith.constant 0 : index
    %30 = vector.load %arg7[%c0_26, %c16_27, %c0_28] : memref<1x35x32xf32, #tpu.memory_space<vmem>>, vector<1x16x32xf32>
    %31 = vector.extract_strided_slice %8 {offsets = [3, 0], sizes = [1, 32], strides = [1, 1]} : vector<7x32xf32> to vector<1x32xf32>
    %32 = vector.shape_cast %31 : vector<1x32xf32> to vector<32xf32>
    %33 = vector.shape_cast %32 : vector<32xf32> to vector<1x1x32xf32>
    %34 = vector.broadcast %33 : vector<1x1x32xf32> to vector<1x16x32xf32>
    %35 = arith.mulf %30, %34 : vector<1x16x32xf32>
    %36 = arith.addf %29, %35 : vector<1x16x32xf32>
    %c0_29 = arith.constant 0 : index
    %c17 = arith.constant 17 : index
    %c0_30 = arith.constant 0 : index
    %37 = vector.load %arg7[%c0_29, %c17, %c0_30] : memref<1x35x32xf32, #tpu.memory_space<vmem>>, vector<1x16x32xf32>
    %38 = vector.extract_strided_slice %8 {offsets = [4, 0], sizes = [1, 32], strides = [1, 1]} : vector<7x32xf32> to vector<1x32xf32>
    %39 = vector.shape_cast %38 : vector<1x32xf32> to vector<32xf32>
    %40 = vector.shape_cast %39 : vector<32xf32> to vector<1x1x32xf32>
    %41 = vector.broadcast %40 : vector<1x1x32xf32> to vector<1x16x32xf32>
    %42 = arith.mulf %37, %41 : vector<1x16x32xf32>
    %43 = arith.addf %36, %42 : vector<1x16x32xf32>
    %c0_31 = arith.constant 0 : index
    %c18 = arith.constant 18 : index
    %c0_32 = arith.constant 0 : index
    %44 = vector.load %arg7[%c0_31, %c18, %c0_32] : memref<1x35x32xf32, #tpu.memory_space<vmem>>, vector<1x16x32xf32>
    %45 = vector.extract_strided_slice %8 {offsets = [5, 0], sizes = [1, 32], strides = [1, 1]} : vector<7x32xf32> to vector<1x32xf32>
    %46 = vector.shape_cast %45 : vector<1x32xf32> to vector<32xf32>
    %47 = vector.shape_cast %46 : vector<32xf32> to vector<1x1x32xf32>
    %48 = vector.broadcast %47 : vector<1x1x32xf32> to vector<1x16x32xf32>
    %49 = arith.mulf %44, %48 : vector<1x16x32xf32>
    %50 = arith.addf %43, %49 : vector<1x16x32xf32>
    %c0_33 = arith.constant 0 : index
    %c19 = arith.constant 19 : index
    %c0_34 = arith.constant 0 : index
    %51 = vector.load %arg7[%c0_33, %c19, %c0_34] : memref<1x35x32xf32, #tpu.memory_space<vmem>>, vector<1x16x32xf32>
    %52 = vector.extract_strided_slice %8 {offsets = [6, 0], sizes = [1, 32], strides = [1, 1]} : vector<7x32xf32> to vector<1x32xf32>
    %53 = vector.shape_cast %52 : vector<1x32xf32> to vector<32xf32>
    %54 = vector.shape_cast %53 : vector<32xf32> to vector<1x1x32xf32>
    %55 = vector.broadcast %54 : vector<1x1x32xf32> to vector<1x16x32xf32>
    %56 = arith.mulf %51, %55 : vector<1x16x32xf32>
    %57 = arith.addf %50, %56 : vector<1x16x32xf32>
    %58 = vector.shape_cast %9 : vector<1x32xf32> to vector<1x1x32xf32>
    %59 = vector.broadcast %58 : vector<1x1x32xf32> to vector<1x16x32xf32>
    %60 = arith.addf %57, %59 : vector<1x16x32xf32>
    %c0_35 = arith.constant 0 : index
    %c0_36 = arith.constant 0 : index
    %c0_37 = arith.constant 0 : index
    %61 = vector.load %arg6[%c0_35, %c0_36, %c0_37] : memref<1x16x32xf32, #tpu.memory_space<vmem>>, vector<1x16x32xf32>
    tpu.vector_store %arg6[%c0_35, %c0_36, %c0_37], %60 {strides = array<i32>} : memref<1x16x32xf32, #tpu.memory_space<vmem>>, vector<1x16x32xf32>,
    return
  }
  func.func @transform_0(%arg0: i32, %arg1: i32) -> (i32, i32, i32) {
    %c0_i32 = arith.constant 0 : i32
    %c0_i32_0 = arith.constant 0 : i32
    return %arg0, %arg1, %c0_i32 : i32, i32, i32
  }
  func.func @transform_1(%arg0: i32, %arg1: i32) -> (i32, i32, i32, i32) {
    %c0_i32 = arith.constant 0 : i32
    %c0_i32_0 = arith.constant 0 : i32
    %c0_i32_1 = arith.constant 0 : i32
    return %arg0, %arg1, %c0_i32, %c0_i32_0 : i32, i32, i32, i32
  }
  func.func @transform_2(%arg0: i32, %arg1: i32) -> (i32, i32) {
    %c0_i32 = arith.constant 0 : i32
    %c0_i32_0 = arith.constant 0 : i32
    %c0_i32_1 = arith.constant 0 : i32
    return %c0_i32, %c0_i32_0 : i32, i32
  }
  func.func @transform_3(%arg0: i32, %arg1: i32) -> (i32, i32) {
    %c0_i32 = arith.constant 0 : i32
    %c0_i32_0 = arith.constant 0 : i32
    %c0_i32_1 = arith.constant 0 : i32
    return %c0_i32, %c0_i32_0 : i32, i32
  }
  func.func @transform_4(%arg0: i32, %arg1: i32) -> (i32, i32, i32) {
    %c0_i32 = arith.constant 0 : i32
    %c0_i32_0 = arith.constant 0 : i32
    return %arg0, %arg1, %c0_i32 : i32, i32, i32
  }
}

</mosaic_0001>

<bundles_post_ra>
// kernel: tpu_custom_call.1
= control target key start
LH: loop header
LB: loop body
LE: loop exit
PB: predicated region body
PF: predicated region fallthrough
CT: control target
= control target key end

     0   :  { %9 = vsyncpa [#allocation4], 0  ;;  %s819_s0 = inlined_call_operand.hbm [shape: f32[2,16,32], index: 0, kind: input, shape index: {}]   ;;  %s820_s1 = inlined_call_operand.vmem [shape: f32[2,1,6,32], index: 1, kind: input, shape index: {}]   ;;  %s821_s2 = inlined_call_operand.vmem [shape: f32[7,32], index: 2, kind: input, shape index: {}]   ;;  %s822_s3 = inlined_call_operand.vmem [shape: f32[1,32], index: 3, kind: input, shape index: {}]   ;;  %s823_s4 = inlined_call_operand.hbm [shape: f32[2,16,32], index: 4, kind: output, shape index: {}]  }
   0x1   :  { %11 = vsyncpa [#allocation4 + $0x1], 0 }
   0x2   :  { %12 = vsyncpa [#allocation5], 0 }
   0x3   :  { %14 = vsyncpa [#allocation5 + $0x1], 0  ;;  %s680_s15 = smov 0   ;;  %s682_s16 = smov 0  }
   0x4   :  { %s684_s17 = smov 0   ;;  %s686_s18 = smov 0  }
   0x5   :  { %s688_s19 = smov 0   ;;  %s690_s20 = smov 0  }
   0x6 LB: > { %s452_s21 = sadd.s32 4294967295, %s649_s20   ;;  %s453_s22 = sadd.s32 4294967294, %s649_s20   ;;  %s649_s20 = sphi %s690_s20, %s20_s20   ;;  %s645_s19 = sphi %s688_s19, %s832_s19   ;;  %s641_s18 = sphi %s686_s18, %s831_s18   ;;  %s637_s17 = sphi %s684_s17, %s830_s17   ;;  %s633_s16 = sphi %s682_s16, %s829_s16   ;;  %s629_s15 = sphi %s680_s15, %s828_s15  }
   0x7   : > { %s32_s23 = sadd.s32 1, %s645_s19  ;;  %s41_s24 = sadd.s32 1, %s637_s17 }
   0x8   : > { %p34_p0 = scmp.ge.s32.totalorder %s32_s23, 2  ;;  %p48_p1 = scmp.ne.s32.totalorder %s637_s17, %s633_s16 }
   0x9   : > { %p49_p2 = scmp.eq.s32.totalorder %s649_s20, 0  ;;  %p54_p3 = scmp.ne.s32.totalorder %s633_s16, %s629_s15 }
   0xa   : > { %s834_s23 = smov (%p34_p0, %s32_s23), 0  ;;  %p55_p5 = scmp.eq.s32.totalorder %s452_s21, 0 }
   0xb   : > { %p721_p4 = por %p49_p2, %p48_p1  ;;  %s36_s26 = ssub.s32 %s645_s19, %s834_s23 }
   0xc   : > { %p150_p6 = scmp.eq.s32.totalorder %s452_s21, 1  ;;  %p39_p7 = scmp.eq.s32.totalorder %s36_s26, 0 }
   0xd   : > { %p727_p8 = por %p55_p5, %p54_p3  ;;  %p156_p10 = scmp.eq.s32.totalorder %s453_s22, 1 }
   0xe   : > { %p731_p9 = por %p150_p6, %p48_p1  ;;  %p455_p12 = scmp.ge.s32.totalorder %s649_s20, 2 }
   0xf   : > { %s736_s29 = scalar_select %p39_p7, %s637_s17, %s41_s24  }
  0x10   : > { %p738_p11 = por %p156_p10, %p54_p3  ;;  %p482_p13 = scmp.lt.s32.totalorder %s649_s20, 2 }
  0x11   : > { %s182_s5 = sand.u32 1, %s637_s17   ;;  %s468_s7 = sshll.u32 %s645_s19, 4 }
  0x12   : > { %s456_s6 = sshll.u32 %s182_s5, 4  ;;  %s193_s10 = scalar_lea.hbm %s819_s0, %s468_s7 }
  0x13   : > { %s186_s11 = scalar_lea.vmem [#allocation3], %s456_s6  ;;  %s194_s13 = sshll.u32 %s193_s10, 4  ;;  %s195_s13 = int_to_ptr.hbm [resolvable:$true] %s194_s13 }
  0x14   : > { %s196_s12 = sshll.u32 %s186_s11, 4  ;;  %p475_p0 = pnand %p482_p13, %p721_p4  ;;  %s197_s12 = int_to_ptr.vmem [resolvable:$true] %s196_s12 }
  0x15   : > { %p459_p1 = scmp.ge.s32.totalorder %s649_s20, 1  ;;  %s183_s14 = scalar_lea.sflag [#allocation4], %s182_s5 }
  0x16   : > { %s651_s21 = smov 128   ;;  %s652_s22 = smov 8  }
  0x17   : > { %477 = dma.hbm_to_vmem [thread:$0]  (!%p475_p0), %s195_s13, 256, %s197_s12, %s183_s14, %s651_s21, %s651_s21, %s652_s22  }
  0x18   : > { %p214_p2 = scmp.lt.s32.totalorder %s649_s20, 3 }
  0x1a   : > { %p215_p3 = pnand %p459_p1, %p214_p2 }
  0x1b   : > { %s754_s24 = sand.u32 (!%p215_p3), 1, %s633_s16  }
  0x1c   : > { %218 = sbr.rel (%p215_p3) target bundleno = 70 (0x46), region = 36  ;;  %s460_s26 = sshll.u32 (!%p215_p3), %s754_s24, 4 }
  0x1d   : > { %s221_s6 = scalar_lea.sflag (!%p215_p3), [#allocation4], %s754_s24  ;;  %s224_s25 = scalar_lea.vmem (!%p215_p3), [#allocation3], %s460_s26 }
  0x21   : > { %620 = dma.done.wait (%p727_p8), %s221_s6, 256  }
  0x22   : > { %622 = vsyncadd (%p727_p8), %s221_s6, 4294967040  ;;  %p258_p4 = scmp.lt.s32.totalorder %s641_s18, 1  ;;  %vm267_vm0 = vcmask 256000   ;;  %vm271_vm1 = vcmask 261120   ;;  %v269_v1 = vld [vmem:[%s224_s25] sm:$0xff]  ;;  %v270_v2 = vld [vmem:[%s224_s25 + $0x8] sm:$0xff] }
  0x23   : > { %272 = vst.msk [vmem:[#allocation2 + $0x10] sm:$0xff] %vm271_vm1, %v269_v1  ;;  %v276_v4 = vld [vmem:[%s821_s2] sm:$0x7f]  ;;  %s469_s12 = sshll.u32 %s641_s18, 4  ;;  %s587_s27 = scalar_lea.hbm %s823_s4, 32 }
  0x24   : > { %s259_s5 = scalar_select %p258_p4, %s641_s18, 1  ;;  %273 = vst.msk [vmem:[#allocation2 + $0x18] sm:$0xff] %vm271_vm1, %v270_v2  ;;  %v280_v5 = vperm.slane %v276_v4, 0  ;;  %v285_v6 = vperm.slane %v276_v4, 1  ;;  %v292_v7 = vperm.slane %v276_v4, 2  ;;  %v299_v13 = vperm.slane %v276_v4, 3 }
  0x25   : > { %v306_v15 = vperm.slane %v276_v4, 4  ;;  %v313_v24 = vperm.slane %v276_v4, 5  ;;  %v320_v31 = vperm.slane %v276_v4, 6  ;;  %s346_s21 = scalar_lea.hbm %s823_s4, %s469_s12  ;;  %v536_v46 = vld [vmem:[%s822_s3] ss:$0 sm:$0xff]  ;;  %s256_s18 = scalar_lea.vmem [#allocation6], %s460_s26 }
  0x26   : > { %s462_s7 = sshll.u32 %s259_s5, 3  ;;  %s347_s25 = sshll.u32 %s256_s18, 4  ;;  %s348_s25 = int_to_ptr.vmem [resolvable:$true] %s347_s25 }
  0x27   : > { %s264_s10 = scalar_lea.vmem %s820_s1, %s462_s7  ;;  %s349_s5 = sshll.u32 %s346_s21, 4  ;;  %s350_s5 = int_to_ptr.hbm [resolvable:$true] %s349_s5 }
  0x28   : > { %v266_v0 = vld [vmem:[%s264_s10] sm:$0x7]  ;;  %v274_v3 = vld [vmem:[%s264_s10 + $0x3] sm:$0x7]  ;;  %s333_s7 = scalar_lea.sflag [#allocation5], %s754_s24  ;;  %s581_s8 = sshra.s32 %s350_s5, 4  ;;  %s582_s8 = int_to_ptr.hbm [resolvable:$true] %s581_s8 }
  0x29   : > { %268 = vst.msk [vmem:[#allocation2 + $0xd] sm:$0x7] %vm267_vm0, %v266_v0  ;;  %s583_s9 = scalar_lea.hbm %s582_s8, 16  ;;  %p588_p8 = scmp.lt.s32.totalorder %s582_s8, %s823_s4 }
  0x2a   : > { %275 = vst.msk [vmem:[#allocation2 + $0x20] sm:$0x7] %vm267_vm0, %v274_v3  ;;  %v297_v14 = vld [vmem:[#allocation2 + $0x10] sm:$0xff]  ;;  %p584_p5 = scmp.ne.s32.totalorder %s582_s8, %s583_s9  ;;  %p589_p10 = scmp.lt.s32.totalorder %s587_s27, %s583_s9 }
  0x2b   : > { %v279_v16 = vld [vmem:[#allocation2 + $0x15] sm:$0xff]  ;;  %v300_v27 = vmul.f32 %v299_v13, %v297_v14 }
  0x2c   : > { %v284_v17 = vld [vmem:[#allocation2 + $0x16] sm:$0xff]  ;;  %v282_v20 = vmul.f32 %v280_v5, %v279_v16  ;;  %p585_p6 = pnand %p584_p5, %p731_p9  ;;  %p590_p13 = por %p589_p10, %p588_p8 }
  0x2d   : > { %v287_v21 = vmul.f32 %v285_v6, %v284_v17  ;;  %v291_v22 = vld [vmem:[#allocation2 + $0x17] sm:$0xff] }
  0x2e   : > { %v304_v23 = vld [vmem:[#allocation2 + $0x11] sm:$0xff]  ;;  %v294_v29 = vmul.f32 %v292_v7, %v291_v22  ;;  %p586_p7 = pneg %p585_p6 }
  0x2f   : > { %v298_v25 = vld [vmem:[#allocation2 + $0x18] sm:$0xff]  ;;  %v289_v28 = vadd.f32 %v287_v21, %v282_v20  ;;  %v307_v34 = vmul.f32 %v306_v15, %v304_v23 }
  0x30   : > { %v278_v8 = vld [vmem:[#allocation2 + $0xd] sm:$0xff]  ;;  %v301_v36 = vmul.f32 %v299_v13, %v298_v25  ;;  %p591_p0 = pnand %p590_p13, %p586_p7 }
  0x31   : > { %v283_v9 = vld [vmem:[#allocation2 + $0xe] sm:$0xff]  ;;  %v281_v11 = vmul.f32 %v280_v5, %v278_v8  ;;  %v305_v32 = vld [vmem:[#allocation2 + $0x19] sm:$0xff]  ;;  %v296_v35 = vadd.f32 %v294_v29, %v289_v28 }
  0x32   : > { %v290_v10 = vld [vmem:[#allocation2 + $0xf] sm:$0xff]  ;;  %v286_v12 = vmul.f32 %v285_v6, %v283_v9  ;;  %v312_v38 = vld [vmem:[#allocation2 + $0x1a] sm:$0xff]  ;;  %v308_v42 = vmul.f32 %v306_v15, %v305_v32 }
  0x33   : > { %v293_v19 = vmul.f32 %v292_v7, %v290_v10  ;;  %v311_v30 = vld [vmem:[#allocation2 + $0x12] sm:$0xff]  ;;  %v303_v41 = vadd.f32 %v301_v36, %v296_v35  ;;  %v319_v43 = vld [vmem:[#allocation2 + $0x1b] sm:$0xff]  ;;  %v315_v48 = vmul.f32 %v313_v24, %v312_v38 }
  0x34   : > { %v288_v18 = vadd.f32 %v286_v12, %v281_v11  ;;  %v318_v37 = vld [vmem:[#allocation2 + $0x13] sm:$0xff]  ;;  %v314_v40 = vmul.f32 %v313_v24, %v311_v30  ;;  %v322_v51 = vmul.f32 %v320_v31, %v319_v43 }
  0x35   : > { %v321_v45 = vmul.f32 %v320_v31, %v318_v37  ;;  %v310_v47 = vadd.f32 %v308_v42, %v303_v41 }
  0x36   : > { %v295_v26 = vadd.f32 %v293_v19, %v288_v18 }
  0x37   : > { %v317_v50 = vadd.f32 %v315_v48, %v310_v47 }
  0x38   : > { %v302_v33 = vadd.f32 %v300_v27, %v295_v26 }
  0x39   : > { %v324_v53 = vadd.f32 %v322_v51, %v317_v50 }
  0x3a   : > { %v309_v39 = vadd.f32 %v307_v34, %v302_v33 }
  0x3b   : > { %v329_v54 = vadd.f32 %v536_v46, %v324_v53 }
  0x3c   : > { %v316_v44 = vadd.f32 %v314_v40, %v309_v39 }
  0x3d   : > { %331 = vst.msk [vmem:[%s256_s18 + $0x8] sm:$0xff] %vm271_vm1, %v329_v54 }
  0x3e   : > { %v323_v49 = vadd.f32 %v321_v45, %v316_v44 }
  0x40   : > { %v328_v52 = vadd.f32 %v536_v46, %v323_v49 }
  0x42   : > { %330 = vst.msk [vmem:[%s256_s18] sm:$0xff] %vm271_vm1, %v328_v52 }
  0x43   : > { %594 = shalt.err (!%p591_p0)
}
  0x44   : > { %s653_s24 = smov 128   ;;  %s654_s13 = smov 8  }
  0x45   : > { %472 = dma.vmem_to_hbm [thread:$0]  (%p731_p9), %s348_s25, 256, %s350_s5, %s333_s7, %s653_s24, %s653_s24, %s654_s13  }
  0x46 PF: > { %s364_s14 = sand.u32 1, %s629_s15   ;;  %p479_p1 = pnand %p455_p12, %p738_p11 }
  0x47   : > { %s365_s21 = scalar_lea.sflag [#allocation5], %s364_s14 }
  0x48   : > { %p480_p2 = pneg %p479_p1 }
  0x4a   : > { %624 = dma.done.wait (%p480_p2), %s365_s21, 256  }
  0x4b   : > { %626 = vsyncadd (%p480_p2), %s365_s21, 4294967040  ;;  %s20_s20 = sadd.s32 1, %s649_s20   ;;  %s828_s15 = smov %s633_s16 }
  0x4c   : > { %p17_p3 = scmp.ge.s32.totalorder %s20_s20, 4   ;;  %s829_s16 = smov %s637_s17 }
  0x4d   : > { %s830_s17 = smov %s736_s29  ;;  %s831_s18 = smov %s645_s19 }
  0x4e   : > { %s832_s19 = smov %s834_s23  ;;  %19 = sbr.rel (!%p17_p3) target bundleno = 6 (0x6), region = 84 }
  0x53   :  { %371 = vsyncpa [#allocation4], 1 }
  0x54   :  { %373 = vsyncpa [#allocation4 + $0x1], 1 }
  0x55   :  { %374 = vsyncpa [#allocation5], 1 }
  0x56   :  { %376 = vsyncpa [#allocation5 + $0x1], 1 }

</bundles_post_ra>
